<compile_context>
chip_gen: v6e
topology: v6e:2x2x1
jax: 0.10.0
libtpu: 0.0.40
codegen_flags: <defaults>
</compile_context>

<pallas_src>
import functools

import jax
import jax.numpy as jnp
from jax.experimental import pallas as pl
from jax.experimental.pallas import tpu as pltpu


def _scale_mul_kernel(s_ref, x_ref, o_ref, *, block_c, c_blocks):
    # s_ref: (C, 1)        full per-channel scale, resident in VMEM
    # x_ref: (block_c, HW) activation rows for this channel block
    # o_ref: (block_c, HW)
    i = pl.program_id(0)
    start = pl.multiple_of((i % c_blocks) * block_c, 8)
    s = s_ref[pl.ds(start, block_c), :]          # (block_c, 1) -> lane broadcast
    o_ref[...] = x_ref[...] * s


def _pick_block_c(rows, C):
    """Largest divisor of C that is a multiple of 8, preferring an even,
    >=2 grid-step count (balances v7x's two TensorCores)."""
    cands = [d for d in range(8, C + 1, 8) if C % d == 0]
    assert cands, "C must have a divisor that is a multiple of 8"
    cands.sort(reverse=True)
    # 1) even number of steps and >= 2 steps
    for d in cands:
        steps = rows // d
        if steps >= 2 and steps % 2 == 0:
            return d
    # 2) any >= 2 steps
    for d in cands:
        if rows // d >= 2:
            return d
    # 3) single step
    return cands[0]


def layer_scale_mul(x, scale, *, block_c=None):
    """x: (N, C, H, W) float32; scale: (C, 1, 1) float32 -> (N, C, H, W)."""
    N, C, H, W = x.shape
    HW = H * W
    rows = N * C

    if block_c is None or C % block_c != 0 or block_c % 8 != 0:
        block_c = _pick_block_c(rows, C)
    assert C % block_c == 0 and block_c % 8 == 0

    x2d = x.reshape(rows, HW)
    s2d = scale.reshape(C, 1)
    c_blocks = C // block_c
    num_steps = rows // block_c

    kernel = functools.partial(_scale_mul_kernel, block_c=block_c, c_blocks=c_blocks)

    out2d = pl.pallas_call(
        kernel,
        out_shape=jax.ShapeDtypeStruct((rows, HW), x.dtype),
        grid_spec=pltpu.PrefetchScalarGridSpec(
            num_scalar_prefetch=0,
            grid=(num_steps,),
            in_specs=[
                # scale: full array, constant index_map -> DMA'd once, stays
                # resident in VMEM across all grid steps.
                pl.BlockSpec((C, 1), lambda i: (0, 0)),
                # x rows: full lane extent (HW) -> lane-dense loads/stores.
                pl.BlockSpec((block_c, HW), lambda i: (i, 0)),
            ],
            out_specs=pl.BlockSpec((block_c, HW), lambda i: (i, 0)),
        ),
        compiler_params=pltpu.CompilerParams(
            dimension_semantics=("parallel",),
        ),
        cost_estimate=pl.CostEstimate(
            flops=rows * HW,
            transcendentals=0,
            bytes_accessed=2 * rows * HW * x.dtype.itemsize + C * scale.dtype.itemsize,
        ),
    )(s2d, x2d)

    return out2d.reshape(N, C, H, W)


if __name__ == "__main__":
    key = jax.random.PRNGKey(0)
    k1, k2 = jax.random.split(key)

    # Shapes implied by the module: x25 = [1, 96, 56, 56], layer_scale1 = [96, 1, 1]
    N, C, H, W = 1, 96, 56, 56
    x25 = jax.random.normal(k1, (N, C, H, W), dtype=jnp.float32)
    # torch.rand -> uniform [0, 1)
    layer_scale1 = jax.random.uniform(k2, (C, 1, 1), dtype=jnp.float32)

    out = layer_scale_mul(x25, layer_scale1)
    out = jax.block_until_ready(out)

    # Reference check (plain JAX broadcasting, same semantics as operator.mul)
    ref = layer_scale1.reshape(1, C, 1, 1) * x25
    assert out.shape == (N, C, H, W)
    assert jnp.allclose(out, ref, atol=1e-6, rtol=1e-6)

    print("KERNEL_OK")
</pallas_src>

<mosaic_0001>
module attributes {stable_mosaic.version = 11 : i64} {
  func.func @_scale_mul_kernel(%arg0: i32, %arg1: memref<96x1xf32, #tpu.memory_space<vmem>>, %arg2: memref<48x3136xf32, #tpu.memory_space<vmem>>, %arg3: memref<48x3136xf32, #tpu.memory_space<vmem>>) attributes {dimension_semantics = [#tpu.dimension_semantics<parallel>], iteration_bounds = array<i64: 2>, scalar_prefetch = 0 : i64, scratch_operands = 0 : i64, tpu.core_type = #tpu.core_type<tc>, window_params = [{pipeline_mode = #tpu.pipeline_mode<synchronous>, transform_indices = @transform_0, window_bounds = array<i64: 96, 1>}, {transform_indices = @transform_1, window_bounds = array<i64: 48, 3136>}, {transform_indices = @transform_2, window_bounds = array<i64: 48, 3136>}]} {
    %c2_i32 = arith.constant 2 : i32
    %c0_i32 = arith.constant 0 : i32
    %0 = arith.cmpi eq, %c2_i32, %c0_i32 : i32
    %c1_i32 = arith.constant 1 : i32
    %1 = arith.select %0, %c1_i32, %c2_i32 : i32
    %2 = arith.remsi %arg0, %1 : i32
    %c0_i32_0 = arith.constant 0 : i32
    %3 = arith.cmpi ne, %2, %c0_i32_0 : i32
    %c0_i32_1 = arith.constant 0 : i32
    %4 = arith.cmpi slt, %2, %c0_i32_1 : i32
    %c0_i32_2 = arith.constant 0 : i32
    %5 = arith.cmpi slt, %1, %c0_i32_2 : i32
    %6 = arith.xori %4, %5 : i1
    %7 = arith.andi %6, %3 : i1
    %8 = arith.addi %2, %1 : i32
    %9 = arith.select %7, %8, %2 : i32
    %c48_i32 = arith.constant 48 : i32
    %10 = arith.muli %9, %c48_i32 : i32
    %11 = tpu.assume_multiple %10, 8 : i32
    %12 = arith.index_cast %11 : i32 to index
    %c0 = arith.constant 0 : index
    %13 = vector.load %arg1[%12, %c0] : memref<96x1xf32, #tpu.memory_space<vmem>>, vector<48x1xf32>
    %c0_3 = arith.constant 0 : index
    %c0_4 = arith.constant 0 : index
    %14 = vector.load %arg2[%c0_3, %c0_4] : memref<48x3136xf32, #tpu.memory_space<vmem>>, vector<48x3136xf32>
    %15 = vector.broadcast %13 : vector<48x1xf32> to vector<48x3136xf32>
    %16 = arith.mulf %14, %15 : vector<48x3136xf32>
    %c0_5 = arith.constant 0 : index
    %c0_6 = arith.constant 0 : index
    %17 = vector.load %arg3[%c0_5, %c0_6] : memref<48x3136xf32, #tpu.memory_space<vmem>>, vector<48x3136xf32>
    tpu.vector_store %arg3[%c0_5, %c0_6], %16 {strides = array<i32>} : memref<48x3136xf32, #tpu.memory_space<vmem>>, vector<48x3136xf32>,
    return
  }
  func.func @transform_0(%arg0: i32) -> (i32, i32) {
    %c0_i32 = arith.constant 0 : i32
    %c0_i32_0 = arith.constant 0 : i32
    %c0_i32_1 = arith.constant 0 : i32
    return %c0_i32, %c0_i32_0 : i32, i32
  }
  func.func @transform_1(%arg0: i32) -> (i32, i32) {
    %c0_i32 = arith.constant 0 : i32
    %c0_i32_0 = arith.constant 0 : i32
    return %arg0, %c0_i32 : i32, i32
  }
  func.func @transform_2(%arg0: i32) -> (i32, i32) {
    %c0_i32 = arith.constant 0 : i32
    %c0_i32_0 = arith.constant 0 : i32
    return %arg0, %c0_i32 : i32, i32
  }
}

</mosaic_0001>

<bundles_post_ra>
// kernel: tpu_custom_call.1
= control target key start
LH: loop header
LB: loop body
LE: loop exit
PB: predicated region body
PF: predicated region fallthrough
CT: control target
= control target key end

     0   :  { %7 = vsyncpa [#allocation3], 0  ;;  %s1577_s0 = inlined_call_operand.vmem [shape: f32[96,1], index: 0, kind: input, shape index: {}]   ;;  %s1578_s1 = inlined_call_operand.hbm [shape: f32[96,3136], index: 1, kind: input, shape index: {}]   ;;  %s1579_s2 = inlined_call_operand.hbm [shape: f32[96,3136], index: 2, kind: output, shape index: {}]  }
   0x1   :  { %9 = vsyncpa [#allocation3 + $0x1], 0 }
   0x2   :  { %10 = vsyncpa [#allocation4], 0 }
   0x3   :  { %12 = vsyncpa [#allocation4 + $0x1], 0  ;;  %s942_s9 = smov 0   ;;  %s944_s10 = smov 0  }
   0x4   :  { %s946_s11 = smov 0   ;;  %s948_s12 = smov 0  }
   0x5 LB: > { %s963_s13 = sadd.s32 4294967295, %s918_s12   ;;  %s756_s14 = sadd.s32 4294967294, %s918_s12   ;;  %s918_s12 = sphi %s948_s12, %s1594_s12   ;;  %s914_s11 = sphi %s946_s11, %s1593_s11   ;;  %s910_s10 = sphi %s944_s10, %s1592_s10   ;;  %s906_s9 = sphi %s942_s9, %s1591_s9  }
   0x6   : > { %s967_s15 = sadd.s32 1, %s918_s12   ;;  %s46_s16 = sadd.s32 1, %s914_s11 }
   0x7   : > { %s43_s17 = ssub.s32 %s918_s12, %s967_s15  ;;  %p53_p0 = scmp.ne.s32.totalorder %s914_s11, %s910_s10 }
   0x8   : > { %p44_p1 = scmp.eq.s32.totalorder %s43_s17, 0  ;;  %p54_p2 = scmp.eq.s32.totalorder %s918_s12, 0 }
   0x9   : > { %p59_p3 = scmp.ne.s32.totalorder %s910_s10, %s906_s9  ;;  %p60_p4 = scmp.eq.s32.totalorder %s963_s13, 0 }
   0xa   : > { %s979_s18 = scalar_select %p44_p1, %s914_s11, %s46_s16  }
   0xb   : > { %p55_p5 = por %p54_p2, %p53_p0  ;;  %p981_p6 = por %p60_p4, %p59_p3 }
   0xc   : > { %p83_p7 = scmp.eq.s32.totalorder %s963_s13, 1  ;;  %p89_p8 = scmp.eq.s32.totalorder %s756_s14, 1 }
   0xd   : > { %s1582_s19 = scalar_select %p981_p6, 1, 0 }
   0xe   : > { %p783_p10 = scmp.lt.s32.totalorder %s918_s12, 2  ;;  %p988_p11 = por %p83_p7, %p53_p0 }
   0xf   : > { %p992_p12 = por %p89_p8, %p59_p3  ;;  %s112_s22 = sand.u32 1, %s914_s11  }
  0x10   : > { %s1583_s20 = scalar_select %p988_p11, 1, 0 }
  0x11   : > { %s1584_s21 = scalar_select %p992_p12, 1, 0 }
  0x12   : > { %s767_s23 = smul.u32 1200, %s112_s22  ;;  %p998_p13 = pnand %p783_p10, %p55_p5 }
  0x13   : > { %s784_s24 = smul.u32 19200, %s918_s12  ;;  %s1010_s3 = scalar_lea.sflag [#allocation3], %s112_s22 }
  0x14   : > { %s116_s29 = scalar_lea.vmem [#allocation2], %s767_s23  ;;  %p828_p2 = pneg %p998_p13 }
  0x15   : > { %s1005_s28 = scalar_lea.hbm %s1578_s1, %s784_s24  ;;  %s124_s30 = sshll.u32 %s116_s29, 4  ;;  %s1007_s30 = int_to_ptr.vmem [resolvable:$true] %s124_s30 }
  0x16   : > { %s826_s4 = scalar_lea.hbm %s1005_s28, 19200  ;;  %s831_s7 = scalar_lea.hbm %s1578_s1, 38400 }
  0x17   : > { %p827_p1 = scmp.ne.s32.totalorder %s1005_s28, %s826_s4  ;;  %p832_p5 = scmp.lt.s32.totalorder %s1005_s28, %s1578_s1 }
  0x18   : > { %p833_p7 = scmp.lt.s32.totalorder %s831_s7, %s826_s4 }
  0x19   : > { %p829_p3 = pnand %p828_p2, %p827_p1 }
  0x1a   : > { %p834_p8 = por %p833_p7, %p832_p5 }
  0x1b   : > { %p830_p4 = pneg %p829_p3 }
  0x1d   : > { %p835_p10 = pnand %p834_p8, %p830_p4 }
  0x1f   : > { %838 = shalt.err (!%p835_p10)
}
  0x20   : > { %s839_s16 = scalar_lea.vmem %s1007_s30, 19200  ;;  %s920_s17 = smov [#allocation2]  }
  0x21   : > { %p840_p9 = scmp.ne.s32.totalorder %s1007_s30, %s839_s16  ;;  %s844_s22 = sshll.u32 %s920_s17, 4  ;;  %s845_s22 = int_to_ptr.vmem [resolvable:$false] %s844_s22 }
  0x22   : > { %s846_s23 = scalar_lea.vmem %s845_s22, 38400  ;;  %p847_p3 = scmp.lt.s32.totalorder %s1007_s30, %s845_s22 }
  0x23   : > { %p842_p0 = pnand %p840_p9, %p828_p2  ;;  %p848_p12 = scmp.lt.s32.totalorder %s846_s23, %s839_s16 }
  0x25   : > { %p843_p1 = pneg %p842_p0  ;;  %p849_p11 = por %p848_p12, %p847_p3 }
  0x27   : > { %p850_p6 = pnand %p849_p11, %p843_p1 }
  0x29   : > { %853 = shalt.err (!%p850_p6)
}
  0x2a   : > { %s921_s24 = smov 3200   ;;  %s922_s26 = smov 200  }
  0x2b   : > { %778 = dma.hbm_to_vmem [thread:$0]  (!%p998_p13), %s1005_s28, 19200, %s1007_s30, %s1010_s3, %s921_s24, %s921_s24, %s922_s26  }
  0x2c   : > { %p132_p9 = scmp.lt.s32.totalorder %s918_s12, 3  ;;  %p1586_p0 = scmp.ge.s32.totalorder %s918_s12, 1 }
  0x2e   : > { %p133_p2 = pnand %p1586_p0, %p132_p9 }
  0x2f   : > { %s1035_s27 = sand.u32 (!%p133_p2), 1, %s910_s10   ;;  %p1587_p6 = scmp.ne.s32.totalorder (!%p133_p2), %s1582_s19, 0 }
  0x30   : > { %136 = sbr.rel (%p133_p2) target bundleno = 281 (0x119), region = 28  ;;  %s139_s4 = scalar_lea.sflag (!%p133_p2), [#allocation3], %s1035_s27 }
  0x31   : > { %s769_s29 = smul.u32 (!%p133_p2), 1200, %s1035_s27 }
  0x33   : > { %s1041_s5 = scalar_lea.vmem (!%p133_p2), [#allocation2], %s769_s29 }
  0x35   : > { %897 = dma.done.wait (%p1587_p6), %s139_s4, 19200  }
  0x36   : > { %899 = vsyncadd (%p1587_p6), %s139_s4, 4294948096  ;;  %p165_p11 = scmp.lt.s32.totalorder %s963_s13, 0  ;;  %s166_s25 = ssub.s32 0, %s963_s13  ;;  %v923_v0 = vmov 0   ;;  %v235_v7 = vld [vmem:[%s1041_s5 + $0x190] sm:$0xff]  ;;  %v236_v8 = vld [vmem:[%s1041_s5 + $0x198] sm:$0xff] }
  0x37   : > { %825 = vset.pattern.permute.xlu1 %v923_v0  ;;  %824 = vset.pattern.permute.xlu0 %v923_v0  ;;  %s761_s28 = smin.u32 %s963_s13, %s166_s25  ;;  %v237_v9 = vld [vmem:[%s1041_s5 + $0x1a0] sm:$0xff]  ;;  %v238_v10 = vld [vmem:[%s1041_s5 + $0x1a8] sm:$0xff]  ;;  %v239_v11 = vld [vmem:[%s1041_s5 + $0x1b0] sm:$0xff]  ;;  %vm539_vm0 = vcmask 523264   ;;  %s1097_s16 = scalar_lea.vmem [#allocation5], %s769_s29 }
  0x38   : > { %s168_s30 = sand.u32 1, %s761_s28   ;;  %v240_v12 = vld [vmem:[%s1041_s5 + $0x1b8] sm:$0xff]  ;;  %v241_v13 = vld [vmem:[%s1041_s5 + $0x1c0] sm:$0xff]  ;;  %v242_v14 = vld [vmem:[%s1041_s5 + $0x1c8] sm:$0xff]  ;;  %s785_s17 = smul.u32 19200, %s963_s13 }
  0x39   : > { %s169_s3 = ssub.s32 0, %s168_s30  ;;  %v243_v15 = vld [vmem:[%s1041_s5 + $0x1d0] sm:$0xff]  ;;  %v244_v16 = vld [vmem:[%s1041_s5 + $0x1d8] sm:$0xff]  ;;  %v245_v17 = vld [vmem:[%s1041_s5 + $0x1e0] sm:$0xff]  ;;  %s681_s22 = sshll.u32 %s1097_s16, 4  ;;  %s1521_s22 = int_to_ptr.vmem [resolvable:$true] %s681_s22 }
  0x3a   : > { %s1596_s3 = smov (!%p165_p11, %s169_s3), %s168_s30  ;;  %v246_v18 = vld [vmem:[%s1041_s5 + $0x1e8] sm:$0xff]  ;;  %v247_v19 = vld [vmem:[%s1041_s5 + $0x1f0] sm:$0xff]  ;;  %v248_v20 = vld [vmem:[%s1041_s5 + $0x1f8] sm:$0xff]  ;;  %s1519_s26 = scalar_lea.hbm %s1579_s2, %s785_s17 }
  0x3b   : > { %p763_p12 = scmp.lt.s32.totalorder %s1596_s3, 0  ;;  %s175_s6 = sadd.s32 2, %s1596_s3  ;;  %v249_v21 = vld [vmem:[%s1041_s5 + $0x200] sm:$0xff]  ;;  %v250_v22 = vld [vmem:[%s1041_s5 + $0x208] sm:$0xff]  ;;  %v251_v23 = vld [vmem:[%s1041_s5 + $0x210] sm:$0xff] }
  0x3c   : > { %v252_v24 = vld [vmem:[%s1041_s5 + $0x218] sm:$0xff]  ;;  %v253_v25 = vld [vmem:[%s1041_s5 + $0x220] sm:$0xff]  ;;  %v254_v26 = vld [vmem:[%s1041_s5 + $0x228] sm:$0xff]  ;;  %s667_s13 = scalar_lea.sflag [#allocation4], %s1035_s27  ;;  %s854_s29 = scalar_lea.vmem %s1521_s22, 19200 }
  0x3d   : > { %s1598_s6 = smov (!%p763_p12, %s175_s6), %s1596_s3  ;;  %v255_v28 = vld [vmem:[%s1041_s5 + $0x230] sm:$0xff]  ;;  %v256_v29 = vld [vmem:[%s1041_s5 + $0x238] sm:$0xff]  ;;  %v257_v30 = vld [vmem:[%s1041_s5 + $0x240] sm:$0xff]  ;;  %p855_p13 = scmp.ne.s32.totalorder %s1521_s22, %s854_s29 }
  0x3e   : > { %s177_s7 = smul.u32 48, %s1598_s6  ;;  %v258_v31 = vld [vmem:[%s1041_s5 + $0x248] sm:$0xff]  ;;  %v259_v36 = vld [vmem:[%s1041_s5 + $0x250] sm:$0xff]  ;;  %v185_v41 = vld [vmem:[%s1041_s5] sm:$0xff]  ;;  %p1588_p4 = scmp.ne.s32.totalorder %s1583_s20, 0 }
  0x3f   : > { %v186_v42 = vld [vmem:[%s1041_s5 + $0x8] sm:$0xff]  ;;  %v187_v43 = vld [vmem:[%s1041_s5 + $0x10] sm:$0xff]  ;;  %v188_v48 = vld [vmem:[%s1041_s5 + $0x18] sm:$0xff]  ;;  %s924_s4 = smov [#allocation5]  }
  0x40   : > { %s178_s14 = scalar_lea.vmem %s1577_s0, %s177_s7  ;;  %v189_v49 = vld [vmem:[%s1041_s5 + $0x20] sm:$0xff]  ;;  %v190_v50 = vld [vmem:[%s1041_s5 + $0x28] sm:$0xff]  ;;  %v191_v51 = vld [vmem:[%s1041_s5 + $0x30] sm:$0xff]  ;;  %p856_p5 = pnand %p855_p13, %p1588_p4 }
  0x41   : > { %v181_v1 = vld [vmem:[%s178_s14 + $0x10] sm:$0xff]  ;;  %v179_v2 = vld [vmem:[%s178_s14] sm:$0xff]  ;;  %v182_v3 = vld [vmem:[%s178_s14 + $0x18] sm:$0xff] }
  0x42   : > { %347 = vperm.xlu1 %825, %v181_v1   ;;  %337 = vperm.xlu0 %824, %v179_v2   ;;  %v180_v4 = vld [vmem:[%s178_s14 + $0x8] sm:$0xff]  ;;  %v183_v6 = vld [vmem:[%s178_s14 + $0x20] sm:$0xff]  ;;  %p857_p7 = pneg %p856_p5 }
  0x43   : > { %v184_v5 = vld [vmem:[%s178_s14 + $0x28] sm:$0xff]  ;;  %v193_v57 = vld [vmem:[%s1041_s5 + $0x40] sm:$0xff]  ;;  %v195_v59 = vld [vmem:[%s1041_s5 + $0x50] sm:$0xff] }
  0x44   : > { %v192_v56 = vld [vmem:[%s1041_s5 + $0x38] sm:$0xff]  ;;  %v194_v58 = vld [vmem:[%s1041_s5 + $0x48] sm:$0xff]  ;;  %v197_v2 = vld [vmem:[%s1041_s5 + $0x60] sm:$0xff] }
  0x45   : > { %v196_v1 = vld [vmem:[%s1041_s5 + $0x58] sm:$0xff] }
  0x46   : > { %352 = vperm.xlu1 %825, %v182_v3   ;;  %342 = vperm.xlu0 %824, %v180_v4   ;;  %v198_v3 = vld [vmem:[%s1041_s5 + $0x68] sm:$0xff]  ;;  %v199_v4 = vld [vmem:[%s1041_s5 + $0x70] sm:$0xff] }
  0x4a   : > { %362 = vperm.xlu1 %825, %v184_v5   ;;  %357 = vperm.xlu0 %824, %v183_v6  }
  0xbd   : > { %v1073_v27 = vpop.permute.xlu1 %347  ;;  %v1119_v60 = vpop.permute.xlu0 %337 }
  0xbe   : > { %v415_v32 = vmul.f32 %v1073_v27, %v235_v7  ;;  %v416_v33 = vmul.f32 %v1073_v27, %v236_v8  ;;  %v417_v34 = vmul.f32 %v1073_v27, %v237_v9  ;;  %v418_v35 = vmul.f32 %v1073_v27, %v238_v10  ;;  %v200_v9 = vld [vmem:[%s1041_s5 + $0x78] sm:$0xff]  ;;  %v201_v10 = vld [vmem:[%s1041_s5 + $0x80] sm:$0xff] }
  0xbf   : > { %v419_v37 = vmul.f32 %v1073_v27, %v239_v11  ;;  %v420_v38 = vmul.f32 %v1073_v27, %v240_v12  ;;  %v421_v39 = vmul.f32 %v1073_v27, %v241_v13  ;;  %v422_v40 = vmul.f32 %v1073_v27, %v242_v14  ;;  %v202_v11 = vld [vmem:[%s1041_s5 + $0x88] sm:$0xff]  ;;  %v203_v12 = vld [vmem:[%s1041_s5 + $0x90] sm:$0xff]  ;;  %v204_v14 = vld [vmem:[%s1041_s5 + $0x98] sm:$0xff] }
  0xc0   : > { %v423_v44 = vmul.f32 %v1073_v27, %v243_v15  ;;  %v424_v45 = vmul.f32 %v1073_v27, %v244_v16  ;;  %v425_v46 = vmul.f32 %v1073_v27, %v245_v17  ;;  %v426_v47 = vmul.f32 %v1073_v27, %v246_v18  ;;  %566 = vst [vmem:[%s1097_s16 + $0x190] sm:$0xff] %v415_v32  ;;  %v205_v15 = vld [vmem:[%s1041_s5 + $0xa0] sm:$0xff]  ;;  %v206_v16 = vld [vmem:[%s1041_s5 + $0xa8] sm:$0xff]  ;;  %v207_v17 = vld [vmem:[%s1041_s5 + $0xb0] sm:$0xff] }
  0xc1   : > { %567 = vst [vmem:[%s1097_s16 + $0x198] sm:$0xff] %v416_v33  ;;  %568 = vst [vmem:[%s1097_s16 + $0x1a0] sm:$0xff] %v417_v34  ;;  %v427_v52 = vmul.f32 %v1073_v27, %v247_v19  ;;  %v428_v53 = vmul.f32 %v1073_v27, %v248_v20  ;;  %v429_v54 = vmul.f32 %v1073_v27, %v249_v21  ;;  %v208_v21 = vld [vmem:[%s1041_s5 + $0xb8] sm:$0xff]  ;;  %v262_v33 = vld [vmem:[%s1041_s5 + $0x268] sm:$0xff] }
  0xc2   : > { %569 = vst [vmem:[%s1097_s16 + $0x1a8] sm:$0xff] %v418_v35  ;;  %v430_v55 = vmul.f32 %v1073_v27, %v250_v22  ;;  %570 = vst [vmem:[%s1097_s16 + $0x1b0] sm:$0xff] %v419_v37  ;;  %v431_v61 = vmul.f32 %v1073_v27, %v251_v23  ;;  %v432_v62 = vmul.f32 %v1073_v27, %v252_v24  ;;  %v209_v22 = vld [vmem:[%s1041_s5 + $0xc0] sm:$0xff]  ;;  %v263_v34 = vld [vmem:[%s1041_s5 + $0x270] sm:$0xff] }
  0xc3   : > { %571 = vst [vmem:[%s1097_s16 + $0x1b8] sm:$0xff] %v420_v38  ;;  %572 = vst [vmem:[%s1097_s16 + $0x1c0] sm:$0xff] %v421_v39  ;;  %v433_v63 = vmul.f32 %v1073_v27, %v253_v25  ;;  %v434_v0 = vmul.f32 %v1073_v27, %v254_v26  ;;  %v435_v5 = vmul.f32 %v1073_v27, %v255_v28  ;;  %v261_v28 = vld [vmem:[%s1041_s5 + $0x260] sm:$0xff]  ;;  %v264_v35 = vld [vmem:[%s1041_s5 + $0x278] sm:$0xff] }
  0xc4   : > { %573 = vst [vmem:[%s1097_s16 + $0x1c8] sm:$0xff] %v422_v40  ;;  %574 = vst [vmem:[%s1097_s16 + $0x1d0] sm:$0xff] %v423_v44  ;;  %v436_v6 = vmul.f32 %v1073_v27, %v256_v29  ;;  %v437_v7 = vmul.f32 %v1073_v27, %v257_v30  ;;  %v438_v8 = vmul.f32 %v1073_v27, %v258_v31  ;;  %v269_v44 = vld [vmem:[%s1041_s5 + $0x2a0] sm:$0xff] }
  0xc5   : > { %575 = vst [vmem:[%s1097_s16 + $0x1d8] sm:$0xff] %v424_v45  ;;  %576 = vst [vmem:[%s1097_s16 + $0x1e0] sm:$0xff] %v425_v46  ;;  %v439_v13 = vmul.f32 %v1073_v27, %v259_v36  ;;  %v365_v18 = vmul.f32 %v1119_v60, %v185_v41  ;;  %v366_v19 = vmul.f32 %v1119_v60, %v186_v42  ;;  %v260_v27 = vld [vmem:[%s1041_s5 + $0x258] sm:$0xff]  ;;  %v265_v36 = vld [vmem:[%s1041_s5 + $0x280] sm:$0xff]  ;;  %v1194_v45 = vpop.permute.xlu1 %352 }
  0xc6   : > { %577 = vst [vmem:[%s1097_s16 + $0x1e8] sm:$0xff] %v426_v47  ;;  %578 = vst [vmem:[%s1097_s16 + $0x1f0] sm:$0xff] %v427_v52  ;;  %v367_v20 = vmul.f32 %v1119_v60, %v187_v43  ;;  %v368_v23 = vmul.f32 %v1119_v60, %v188_v48  ;;  %v369_v24 = vmul.f32 %v1119_v60, %v189_v49  ;;  %v266_v41 = vld [vmem:[%s1041_s5 + $0x288] sm:$0xff]  ;;  %v267_v42 = vld [vmem:[%s1041_s5 + $0x290] sm:$0xff] }
  0xc7   : > { %579 = vst [vmem:[%s1097_s16 + $0x1f8] sm:$0xff] %v428_v53  ;;  %580 = vst [vmem:[%s1097_s16 + $0x200] sm:$0xff] %v429_v54  ;;  %v370_v25 = vmul.f32 %v1119_v60, %v190_v50  ;;  %v371_v26 = vmul.f32 %v1119_v60, %v191_v51  ;;  %v372_v29 = vmul.f32 %v1119_v60, %v192_v56  ;;  %v268_v43 = vld [vmem:[%s1041_s5 + $0x298] sm:$0xff]  ;;  %v270_v50 = vld [vmem:[%s1041_s5 + $0x2a8] sm:$0xff] }
  0xc8   : > { %581 = vst [vmem:[%s1097_s16 + $0x208] sm:$0xff] %v430_v55  ;;  %582 = vst [vmem:[%s1097_s16 + $0x210] sm:$0xff] %v431_v61  ;;  %v373_v30 = vmul.f32 %v1119_v60, %v193_v57  ;;  %v374_v31 = vmul.f32 %v1119_v60, %v194_v58  ;;  %v375_v32 = vmul.f32 %v1119_v60, %v195_v59  ;;  %v271_v51 = vld [vmem:[%s1041_s5 + $0x2b0] sm:$0xff]  ;;  %v272_v52 = vld [vmem:[%s1041_s5 + $0x2b8] sm:$0xff] }
  0xc9   : > { %583 = vst [vmem:[%s1097_s16 + $0x218] sm:$0xff] %v432_v62  ;;  %584 = vst [vmem:[%s1097_s16 + $0x220] sm:$0xff] %v433_v63  ;;  %v376_v37 = vmul.f32 %v1119_v60, %v196_v1  ;;  %v377_v38 = vmul.f32 %v1119_v60, %v197_v2  ;;  %v378_v39 = vmul.f32 %v1119_v60, %v198_v3  ;;  %v273_v53 = vld [vmem:[%s1041_s5 + $0x2c0] sm:$0xff]  ;;  %v274_v58 = vld [vmem:[%s1041_s5 + $0x2c8] sm:$0xff] }
  0xca   : > { %585 = vst [vmem:[%s1097_s16 + $0x228] sm:$0xff] %v434_v0  ;;  %586 = vst [vmem:[%s1097_s16 + $0x230] sm:$0xff] %v435_v5  ;;  %v379_v40 = vmul.f32 %v1119_v60, %v199_v4  ;;  %v380_v46 = vmul.f32 %v1119_v60, %v200_v9  ;;  %v381_v47 = vmul.f32 %v1119_v60, %v201_v10  ;;  %v275_v59 = vld [vmem:[%s1041_s5 + $0x2d0] sm:$0xff]  ;;  %v276_v61 = vld [vmem:[%s1041_s5 + $0x2d8] sm:$0xff] }
  0xcb   : > { %587 = vst [vmem:[%s1097_s16 + $0x238] sm:$0xff] %v436_v6  ;;  %588 = vst [vmem:[%s1097_s16 + $0x240] sm:$0xff] %v437_v7  ;;  %v382_v48 = vmul.f32 %v1119_v60, %v202_v11  ;;  %v383_v49 = vmul.f32 %v1119_v60, %v203_v12  ;;  %v384_v54 = vmul.f32 %v1119_v60, %v204_v14  ;;  %v277_v62 = vld [vmem:[%s1041_s5 + $0x2e0] sm:$0xff]  ;;  %v278_v1 = vld [vmem:[%s1041_s5 + $0x2e8] sm:$0xff] }
  0xcc   : > { %589 = vst [vmem:[%s1097_s16 + $0x248] sm:$0xff] %v438_v8  ;;  %515 = vst [vmem:[%s1097_s16] sm:$0xff] %v365_v18  ;;  %v385_v55 = vmul.f32 %v1119_v60, %v205_v15  ;;  %v386_v56 = vmul.f32 %v1119_v60, %v206_v16  ;;  %v387_v57 = vmul.f32 %v1119_v60, %v207_v17  ;;  %v279_v2 = vld [vmem:[%s1041_s5 + $0x2f0] sm:$0xff]  ;;  %v280_v3 = vld [vmem:[%s1041_s5 + $0x2f8] sm:$0xff] }
  0xcd   : > { %516 = vst [vmem:[%s1097_s16 + $0x8] sm:$0xff] %v366_v19  ;;  %517 = vst [vmem:[%s1097_s16 + $0x10] sm:$0xff] %v367_v20  ;;  %v388_v63 = vmul.f32 %v1119_v60, %v208_v21  ;;  %v389_v0 = vmul.f32 %v1119_v60, %v209_v22  ;;  %v281_v4 = vld [vmem:[%s1041_s5 + $0x300] sm:$0xff]  ;;  %v440_v5 = vmul.f32 %v1194_v45, %v260_v27  ;;  %v282_v60 = vld [vmem:[%s1041_s5 + $0x308] sm:$0xff] }
  0xce   : > { %590 = vst.msk [vmem:[%s1097_s16 + $0x250] sm:$0xff] %vm539_vm0, %v439_v13  ;;  %518 = vst [vmem:[%s1097_s16 + $0x18] sm:$0xff] %v368_v23  ;;  %v441_v6 = vmul.f32 %v1194_v45, %v261_v28  ;;  %v283_v7 = vld [vmem:[%s1041_s5 + $0x310] sm:$0xff]  ;;  %v284_v8 = vld [vmem:[%s1041_s5 + $0x318] sm:$0xff]  ;;  %v442_v9 = vmul.f32 %v1194_v45, %v262_v33  ;;  %v443_v10 = vmul.f32 %v1194_v45, %v263_v34 }
  0xcf   : > { %519 = vst [vmem:[%s1097_s16 + $0x20] sm:$0xff] %v369_v24  ;;  %520 = vst [vmem:[%s1097_s16 + $0x28] sm:$0xff] %v370_v25  ;;  %v444_v11 = vmul.f32 %v1194_v45, %v264_v35  ;;  %v445_v12 = vmul.f32 %v1194_v45, %v265_v36  ;;  %v210_v13 = vld [vmem:[%s1041_s5 + $0xc8] sm:$0xff]  ;;  %v446_v14 = vmul.f32 %v1194_v45, %v266_v41  ;;  %v211_v18 = vld [vmem:[%s1041_s5 + $0xd0] sm:$0xff] }
  0xd0   : > { %521 = vst [vmem:[%s1097_s16 + $0x30] sm:$0xff] %v371_v26  ;;  %522 = vst [vmem:[%s1097_s16 + $0x38] sm:$0xff] %v372_v29  ;;  %v447_v15 = vmul.f32 %v1194_v45, %v267_v42  ;;  %v448_v16 = vmul.f32 %v1194_v45, %v268_v43  ;;  %v449_v17 = vmul.f32 %v1194_v45, %v269_v44  ;;  %v212_v19 = vld [vmem:[%s1041_s5 + $0xd8] sm:$0xff]  ;;  %v213_v20 = vld [vmem:[%s1041_s5 + $0xe0] sm:$0xff] }
  0xd1   : > { %523 = vst [vmem:[%s1097_s16 + $0x40] sm:$0xff] %v373_v30  ;;  %524 = vst [vmem:[%s1097_s16 + $0x48] sm:$0xff] %v374_v31  ;;  %v214_v21 = vld [vmem:[%s1041_s5 + $0xe8] sm:$0xff]  ;;  %v450_v22 = vmul.f32 %v1194_v45, %v270_v50  ;;  %v451_v23 = vmul.f32 %v1194_v45, %v271_v51  ;;  %v452_v24 = vmul.f32 %v1194_v45, %v272_v52  ;;  %v215_v26 = vld [vmem:[%s1041_s5 + $0xf0] sm:$0xff]  ;;  %v1269_v30 = vpop.permute.xlu0 %342 }
  0xd2   : > { %525 = vst [vmem:[%s1097_s16 + $0x50] sm:$0xff] %v375_v32  ;;  %526 = vst [vmem:[%s1097_s16 + $0x58] sm:$0xff] %v376_v37  ;;  %v453_v25 = vmul.f32 %v1194_v45, %v273_v53  ;;  %v216_v27 = vld [vmem:[%s1041_s5 + $0xf8] sm:$0xff]  ;;  %v217_v28 = vld [vmem:[%s1041_s5 + $0x100] sm:$0xff]  ;;  %v454_v31 = vmul.f32 %v1194_v45, %v274_v58  ;;  %v455_v32 = vmul.f32 %v1194_v45, %v275_v59 }
  0xd3   : > { %527 = vst [vmem:[%s1097_s16 + $0x60] sm:$0xff] %v377_v38  ;;  %528 = vst [vmem:[%s1097_s16 + $0x68] sm:$0xff] %v378_v39  ;;  %v218_v29 = vld [vmem:[%s1041_s5 + $0x108] sm:$0xff]  ;;  %v456_v33 = vmul.f32 %v1194_v45, %v276_v61  ;;  %v457_v34 = vmul.f32 %v1194_v45, %v277_v62  ;;  %v219_v35 = vld [vmem:[%s1041_s5 + $0x110] sm:$0xff]  ;;  %v458_v39 = vmul.f32 %v1194_v45, %v278_v1 }
  0xd4   : > { %529 = vst [vmem:[%s1097_s16 + $0x70] sm:$0xff] %v379_v40  ;;  %530 = vst [vmem:[%s1097_s16 + $0x78] sm:$0xff] %v380_v46  ;;  %v220_v36 = vld [vmem:[%s1041_s5 + $0x118] sm:$0xff]  ;;  %v221_v37 = vld [vmem:[%s1041_s5 + $0x120] sm:$0xff]  ;;  %v459_v40 = vmul.f32 %v1194_v45, %v279_v2  ;;  %v460_v41 = vmul.f32 %v1194_v45, %v280_v3  ;;  %v461_v42 = vmul.f32 %v1194_v45, %v281_v4 }
  0xd5   : > { %531 = vst [vmem:[%s1097_s16 + $0x80] sm:$0xff] %v381_v47  ;;  %532 = vst [vmem:[%s1097_s16 + $0x88] sm:$0xff] %v382_v48  ;;  %v222_v38 = vld [vmem:[%s1041_s5 + $0x128] sm:$0xff]  ;;  %v223_v43 = vld [vmem:[%s1041_s5 + $0x130] sm:$0xff]  ;;  %v462_v48 = vmul.f32 %v1194_v45, %v282_v60  ;;  %v464_v50 = vmul.f32 %v1194_v45, %v284_v8  ;;  %v391_v59 = vmul.f32 %v1269_v30, %v211_v18 }
  0xd6   : > { %533 = vst [vmem:[%s1097_s16 + $0x90] sm:$0xff] %v383_v49  ;;  %534 = vst [vmem:[%s1097_s16 + $0x98] sm:$0xff] %v384_v54  ;;  %v224_v44 = vld [vmem:[%s1041_s5 + $0x138] sm:$0xff]  ;;  %v225_v46 = vld [vmem:[%s1041_s5 + $0x140] sm:$0xff]  ;;  %v463_v49 = vmul.f32 %v1194_v45, %v283_v7  ;;  %v392_v61 = vmul.f32 %v1269_v30, %v212_v19  ;;  %v393_v62 = vmul.f32 %v1269_v30, %v213_v20 }
  0xd7   : > { %535 = vst [vmem:[%s1097_s16 + $0xa0] sm:$0xff] %v385_v55  ;;  %536 = vst [vmem:[%s1097_s16 + $0xa8] sm:$0xff] %v386_v56  ;;  %v226_v47 = vld [vmem:[%s1041_s5 + $0x148] sm:$0xff]  ;;  %v227_v51 = vld [vmem:[%s1041_s5 + $0x150] sm:$0xff]  ;;  %v390_v55 = vmul.f32 %v1269_v30, %v210_v13  ;;  %v396_v1 = vmul.f32 %v1269_v30, %v216_v27  ;;  %v397_v2 = vmul.f32 %v1269_v30, %v217_v28 }
  0xd8   : > { %537 = vst [vmem:[%s1097_s16 + $0xb0] sm:$0xff] %v387_v57  ;;  %538 = vst [vmem:[%s1097_s16 + $0xb8] sm:$0xff] %v388_v63  ;;  %v228_v52 = vld [vmem:[%s1041_s5 + $0x158] sm:$0xff]  ;;  %v229_v53 = vld [vmem:[%s1041_s5 + $0x160] sm:$0xff]  ;;  %v394_v63 = vmul.f32 %v1269_v30, %v214_v21  ;;  %v398_v3 = vmul.f32 %v1269_v30, %v218_v29  ;;  %v399_v7 = vmul.f32 %v1269_v30, %v219_v35 }
  0xd9   : > { %591 = vst [vmem:[%s1097_s16 + $0x258] sm:$0xff] %v440_v5  ;;  %592 = vst [vmem:[%s1097_s16 + $0x260] sm:$0xff] %v441_v6  ;;  %v230_v54 = vld [vmem:[%s1041_s5 + $0x168] sm:$0xff]  ;;  %v231_v45 = vld [vmem:[%s1041_s5 + $0x170] sm:$0xff]  ;;  %v400_v8 = vmul.f32 %v1269_v30, %v220_v36  ;;  %v406_v18 = vmul.f32 %v1269_v30, %v226_v47 }
  0xda   : > { %540 = vst.msk [vmem:[%s1097_s16 + $0xc0] sm:$0xff] %vm539_vm0, %v389_v0  ;;  %593 = vst [vmem:[%s1097_s16 + $0x268] sm:$0xff] %v442_v9  ;;  %v232_v56 = vld [vmem:[%s1041_s5 + $0x178] sm:$0xff]  ;;  %v233_v57 = vld [vmem:[%s1041_s5 + $0x180] sm:$0xff]  ;;  %v395_v0 = vmul.f32 %v1269_v30, %v215_v26  ;;  %v401_v9 = vmul.f32 %v1269_v30, %v221_v37  ;;  %v409_v26 = vmul.f32 %v1269_v30, %v229_v53 }
  0xdb   : > { %594 = vst [vmem:[%s1097_s16 + $0x270] sm:$0xff] %v443_v10  ;;  %595 = vst [vmem:[%s1097_s16 + $0x278] sm:$0xff] %v444_v11  ;;  %v234_v58 = vld [vmem:[%s1041_s5 + $0x188] sm:$0xff]  ;;  %v311_v5 = vld [vmem:[%s1041_s5 + $0x3f0] sm:$0xff]  ;;  %v402_v10 = vmul.f32 %v1269_v30, %v222_v38  ;;  %v410_v27 = vmul.f32 %v1269_v30, %v230_v54  ;;  %v413_v35 = vmul.f32 %v1269_v30, %v233_v57 }
  0xdc   : > { %596 = vst [vmem:[%s1097_s16 + $0x280] sm:$0xff] %v445_v12  ;;  %597 = vst [vmem:[%s1097_s16 + $0x288] sm:$0xff] %v446_v14  ;;  %v310_v4 = vld [vmem:[%s1041_s5 + $0x3e8] sm:$0xff]  ;;  %v312_v6 = vld [vmem:[%s1041_s5 + $0x3f8] sm:$0xff]  ;;  %v414_v36 = vmul.f32 %v1269_v30, %v234_v58 }
  0xdd   : > { %598 = vst [vmem:[%s1097_s16 + $0x290] sm:$0xff] %v447_v15  ;;  %599 = vst [vmem:[%s1097_s16 + $0x298] sm:$0xff] %v448_v16  ;;  %v313_v60 = vld [vmem:[%s1041_s5 + $0x400] sm:$0xff]  ;;  %v314_v11 = vld [vmem:[%s1041_s5 + $0x408] sm:$0xff]  ;;  %v403_v15 = vmul.f32 %v1269_v30, %v223_v43  ;;  %v404_v16 = vmul.f32 %v1269_v30, %v224_v44 }
  0xde   : > { %600 = vst [vmem:[%s1097_s16 + $0x2a0] sm:$0xff] %v449_v17  ;;  %601 = vst [vmem:[%s1097_s16 + $0x2a8] sm:$0xff] %v450_v22  ;;  %v315_v12 = vld [vmem:[%s1041_s5 + $0x410] sm:$0xff]  ;;  %v316_v13 = vld [vmem:[%s1041_s5 + $0x418] sm:$0xff]  ;;  %v405_v17 = vmul.f32 %v1269_v30, %v225_v46 }
  0xdf   : > { %602 = vst [vmem:[%s1097_s16 + $0x2b0] sm:$0xff] %v451_v23  ;;  %603 = vst [vmem:[%s1097_s16 + $0x2b8] sm:$0xff] %v452_v24  ;;  %v317_v14 = vld [vmem:[%s1041_s5 + $0x420] sm:$0xff]  ;;  %v318_v19 = vld [vmem:[%s1041_s5 + $0x428] sm:$0xff]  ;;  %v1356_v23 = vpop.permute.xlu1 %362  ;;  %v407_v24 = vmul.f32 %v1269_v30, %v227_v51 }
  0xe0   : > { %604 = vst [vmem:[%s1097_s16 + $0x2c0] sm:$0xff] %v453_v25  ;;  %605 = vst [vmem:[%s1097_s16 + $0x2c8] sm:$0xff] %v454_v31  ;;  %v319_v20 = vld [vmem:[%s1041_s5 + $0x430] sm:$0xff]  ;;  %v320_v21 = vld [vmem:[%s1041_s5 + $0x438] sm:$0xff]  ;;  %v408_v25 = vmul.f32 %v1269_v30, %v228_v52  ;;  %v490_v44 = vmul.f32 %v1356_v23, %v310_v4  ;;  %v491_v46 = vmul.f32 %v1356_v23, %v311_v5 }
  0xe1   : > { %606 = vst [vmem:[%s1097_s16 + $0x2d0] sm:$0xff] %v455_v32  ;;  %607 = vst [vmem:[%s1097_s16 + $0x2d8] sm:$0xff] %v456_v33  ;;  %v321_v22 = vld [vmem:[%s1041_s5 + $0x440] sm:$0xff]  ;;  %v322_v28 = vld [vmem:[%s1041_s5 + $0x448] sm:$0xff]  ;;  %v411_v33 = vmul.f32 %v1269_v30, %v231_v45  ;;  %v492_v47 = vmul.f32 %v1356_v23, %v312_v6  ;;  %v495_v51 = vmul.f32 %v1356_v23, %v315_v12  ;;  %v1428_v6 = vpop.permute.xlu0 %357 }
  0xe2   : > { %608 = vst [vmem:[%s1097_s16 + $0x2e0] sm:$0xff] %v457_v34  ;;  %609 = vst [vmem:[%s1097_s16 + $0x2e8] sm:$0xff] %v458_v39  ;;  %v323_v29 = vld [vmem:[%s1041_s5 + $0x450] sm:$0xff]  ;;  %v324_v31 = vld [vmem:[%s1041_s5 + $0x458] sm:$0xff]  ;;  %v412_v34 = vmul.f32 %v1269_v30, %v232_v56  ;;  %v496_v52 = vmul.f32 %v1356_v23, %v316_v13  ;;  %v497_v53 = vmul.f32 %v1356_v23, %v317_v14 }
  0xe3   : > { %610 = vst [vmem:[%s1097_s16 + $0x2f0] sm:$0xff] %v459_v40  ;;  %611 = vst [vmem:[%s1097_s16 + $0x2f8] sm:$0xff] %v460_v41  ;;  %v325_v32 = vld [vmem:[%s1041_s5 + $0x460] sm:$0xff]  ;;  %v326_v37 = vld [vmem:[%s1041_s5 + $0x468] sm:$0xff]  ;;  %v498_v45 = vmul.f32 %v1356_v23, %v318_v19  ;;  %v499_v56 = vmul.f32 %v1356_v23, %v319_v20  ;;  %v500_v57 = vmul.f32 %v1356_v23, %v320_v21 }
  0xe4   : > { %612 = vst [vmem:[%s1097_s16 + $0x300] sm:$0xff] %v461_v42  ;;  %613 = vst [vmem:[%s1097_s16 + $0x308] sm:$0xff] %v462_v48  ;;  %v327_v38 = vld [vmem:[%s1041_s5 + $0x470] sm:$0xff]  ;;  %v328_v39 = vld [vmem:[%s1041_s5 + $0x478] sm:$0xff]  ;;  %v493_v48 = vmul.f32 %v1356_v23, %v313_v60  ;;  %v501_v58 = vmul.f32 %v1356_v23, %v321_v22  ;;  %v506_v60 = vmul.f32 %v1356_v23, %v326_v37 }
  0xe5   : > { %614 = vst [vmem:[%s1097_s16 + $0x310] sm:$0xff] %v463_v49  ;;  %541 = vst [vmem:[%s1097_s16 + $0xc8] sm:$0xff] %v390_v55  ;;  %v329_v40 = vld [vmem:[%s1041_s5 + $0x480] sm:$0xff]  ;;  %v330_v41 = vld [vmem:[%s1041_s5 + $0x488] sm:$0xff] }
  0xe6   : > { %615 = vst.msk [vmem:[%s1097_s16 + $0x318] sm:$0xff] %vm539_vm0, %v464_v50  ;;  %542 = vst [vmem:[%s1097_s16 + $0xd0] sm:$0xff] %v391_v59  ;;  %v331_v30 = vld [vmem:[%s1041_s5 + $0x490] sm:$0xff]  ;;  %v332_v42 = vld [vmem:[%s1041_s5 + $0x498] sm:$0xff]  ;;  %v494_v50 = vmul.f32 %v1356_v23, %v314_v11  ;;  %v510_v13 = vmul.f32 %v1356_v23, %v330_v41 }
  0xe7   : > { %543 = vst [vmem:[%s1097_s16 + $0xd8] sm:$0xff] %v392_v61  ;;  %544 = vst [vmem:[%s1097_s16 + $0xe0] sm:$0xff] %v393_v62  ;;  %v333_v43 = vld [vmem:[%s1041_s5 + $0x4a0] sm:$0xff]  ;;  %v334_v49 = vld [vmem:[%s1041_s5 + $0x4a8] sm:$0xff]  ;;  %v511_v14 = vmul.f32 %v1356_v23, %v331_v30 }
  0xe8   : > { %545 = vst [vmem:[%s1097_s16 + $0xe8] sm:$0xff] %v394_v63  ;;  %546 = vst [vmem:[%s1097_s16 + $0xf0] sm:$0xff] %v395_v0  ;;  %v285_v54 = vld [vmem:[%s1041_s5 + $0x320] sm:$0xff]  ;;  %v286_v55 = vld [vmem:[%s1041_s5 + $0x328] sm:$0xff]  ;;  %v502_v63 = vmul.f32 %v1356_v23, %v322_v28  ;;  %v503_v0 = vmul.f32 %v1356_v23, %v323_v29  ;;  %v514_v20 = vmul.f32 %v1356_v23, %v334_v49 }
  0xe9   : > { %547 = vst [vmem:[%s1097_s16 + $0xf8] sm:$0xff] %v396_v1  ;;  %548 = vst [vmem:[%s1097_s16 + $0x100] sm:$0xff] %v397_v2  ;;  %v287_v59 = vld [vmem:[%s1041_s5 + $0x330] sm:$0xff]  ;;  %v288_v61 = vld [vmem:[%s1041_s5 + $0x338] sm:$0xff]  ;;  %v504_v1 = vmul.f32 %v1356_v23, %v324_v31  ;;  %v505_v2 = vmul.f32 %v1356_v23, %v325_v32 }
  0xea   : > { %549 = vst [vmem:[%s1097_s16 + $0x108] sm:$0xff] %v398_v3  ;;  %550 = vst [vmem:[%s1097_s16 + $0x110] sm:$0xff] %v399_v7  ;;  %v289_v62 = vld [vmem:[%s1041_s5 + $0x340] sm:$0xff]  ;;  %v290_v3 = vld [vmem:[%s1041_s5 + $0x348] sm:$0xff]  ;;  %v507_v7 = vmul.f32 %v1356_v23, %v327_v38  ;;  %v468_v31 = vmul.f32 %v1428_v6, %v288_v61 }
  0xeb   : > { %551 = vst [vmem:[%s1097_s16 + $0x118] sm:$0xff] %v400_v8  ;;  %552 = vst [vmem:[%s1097_s16 + $0x120] sm:$0xff] %v401_v9  ;;  %v291_v4 = vld [vmem:[%s1041_s5 + $0x350] sm:$0xff]  ;;  %v292_v5 = vld [vmem:[%s1041_s5 + $0x358] sm:$0xff]  ;;  %v508_v8 = vmul.f32 %v1356_v23, %v328_v39  ;;  %v509_v9 = vmul.f32 %v1356_v23, %v329_v40  ;;  %v469_v32 = vmul.f32 %v1428_v6, %v289_v62 }
  0xec   : > { %553 = vst [vmem:[%s1097_s16 + $0x128] sm:$0xff] %v402_v10  ;;  %554 = vst [vmem:[%s1097_s16 + $0x130] sm:$0xff] %v403_v15  ;;  %v293_v10 = vld [vmem:[%s1041_s5 + $0x360] sm:$0xff]  ;;  %v294_v11 = vld [vmem:[%s1041_s5 + $0x368] sm:$0xff]  ;;  %v512_v15 = vmul.f32 %v1356_v23, %v332_v42  ;;  %v472_v38 = vmul.f32 %v1428_v6, %v292_v5 }
  0xed   : > { %555 = vst [vmem:[%s1097_s16 + $0x138] sm:$0xff] %v404_v16  ;;  %556 = vst [vmem:[%s1097_s16 + $0x140] sm:$0xff] %v405_v17  ;;  %v295_v12 = vld [vmem:[%s1041_s5 + $0x370] sm:$0xff]  ;;  %v513_v16 = vmul.f32 %v1356_v23, %v333_v43  ;;  %v296_v17 = vld [vmem:[%s1041_s5 + $0x378] sm:$0xff]  ;;  %v473_v39 = vmul.f32 %v1428_v6, %v293_v10  ;;  %v474_v40 = vmul.f32 %v1428_v6, %v294_v11 }
  0xee   : > { %557 = vst [vmem:[%s1097_s16 + $0x148] sm:$0xff] %v406_v18  ;;  %558 = vst [vmem:[%s1097_s16 + $0x150] sm:$0xff] %v407_v24  ;;  %v297_v18 = vld [vmem:[%s1041_s5 + $0x380] sm:$0xff]  ;;  %v298_v19 = vld [vmem:[%s1041_s5 + $0x388] sm:$0xff]  ;;  %v475_v41 = vmul.f32 %v1428_v6, %v295_v12  ;;  %v476_v43 = vmul.f32 %v1428_v6, %v296_v17 }
  0xef   : > { %559 = vst [vmem:[%s1097_s16 + $0x158] sm:$0xff] %v408_v25  ;;  %560 = vst [vmem:[%s1097_s16 + $0x160] sm:$0xff] %v409_v26  ;;  %v299_v21 = vld [vmem:[%s1041_s5 + $0x390] sm:$0xff]  ;;  %v300_v22 = vld [vmem:[%s1041_s5 + $0x398] sm:$0xff]  ;;  %v465_v25 = vmul.f32 %v1428_v6, %v285_v54  ;;  %v466_v26 = vmul.f32 %v1428_v6, %v286_v55 }
  0xf0   : > { %561 = vst [vmem:[%s1097_s16 + $0x168] sm:$0xff] %v410_v27  ;;  %562 = vst [vmem:[%s1097_s16 + $0x170] sm:$0xff] %v411_v33  ;;  %v301_v24 = vld [vmem:[%s1041_s5 + $0x3a0] sm:$0xff]  ;;  %v467_v27 = vmul.f32 %v1428_v6, %v287_v59  ;;  %v302_v23 = vld [vmem:[%s1041_s5 + $0x3a8] sm:$0xff]  ;;  %v470_v33 = vmul.f32 %v1428_v6, %v290_v3 }
  0xf1   : > { %563 = vst [vmem:[%s1097_s16 + $0x178] sm:$0xff] %v412_v34  ;;  %564 = vst [vmem:[%s1097_s16 + $0x180] sm:$0xff] %v413_v35  ;;  %v303_v28 = vld [vmem:[%s1041_s5 + $0x3b0] sm:$0xff]  ;;  %v304_v29 = vld [vmem:[%s1041_s5 + $0x3b8] sm:$0xff]  ;;  %v471_v34 = vmul.f32 %v1428_v6, %v291_v4  ;;  %v481_v49 = vmul.f32 %v1428_v6, %v301_v24 }
  0xf2   : > { %565 = vst.msk [vmem:[%s1097_s16 + $0x188] sm:$0xff] %vm539_vm0, %v414_v36  ;;  %641 = vst [vmem:[%s1097_s16 + $0x3e8] sm:$0xff] %v490_v44  ;;  %v305_v35 = vld [vmem:[%s1041_s5 + $0x3c0] sm:$0xff]  ;;  %v306_v36 = vld [vmem:[%s1041_s5 + $0x3c8] sm:$0xff]  ;;  %v477_v44 = vmul.f32 %v1428_v6, %v297_v18 }
  0xf3   : > { %642 = vst [vmem:[%s1097_s16 + $0x3f0] sm:$0xff] %v491_v46  ;;  %643 = vst [vmem:[%s1097_s16 + $0x3f8] sm:$0xff] %v492_v47  ;;  %v307_v37 = vld [vmem:[%s1041_s5 + $0x3d0] sm:$0xff]  ;;  %v308_v30 = vld [vmem:[%s1041_s5 + $0x3d8] sm:$0xff]  ;;  %v478_v46 = vmul.f32 %v1428_v6, %v298_v19  ;;  %v479_v47 = vmul.f32 %v1428_v6, %v299_v21  ;;  %v486_v54 = vmul.f32 %v1428_v6, %v306_v36 }
  0xf4   : > { %644 = vst [vmem:[%s1097_s16 + $0x400] sm:$0xff] %v493_v48  ;;  %645 = vst [vmem:[%s1097_s16 + $0x408] sm:$0xff] %v494_v50  ;;  %v309_v42 = vld [vmem:[%s1041_s5 + $0x3e0] sm:$0xff]  ;;  %v480_v48 = vmul.f32 %v1428_v6, %v300_v22  ;;  %v482_v50 = vmul.f32 %v1428_v6, %v302_v23  ;;  %v487_v55 = vmul.f32 %v1428_v6, %v307_v37  ;;  %s858_s5 = sshll.u32 %s924_s4, 4  ;;  %s859_s5 = int_to_ptr.vmem [resolvable:$false] %s858_s5 }
  0xf5   : > { %646 = vst [vmem:[%s1097_s16 + $0x410] sm:$0xff] %v495_v51  ;;  %647 = vst [vmem:[%s1097_s16 + $0x418] sm:$0xff] %v496_v52  ;;  %v483_v51 = vmul.f32 %v1428_v6, %v303_v28  ;;  %v484_v52 = vmul.f32 %v1428_v6, %v304_v29  ;;  %s860_s25 = scalar_lea.vmem %s859_s5, 38400  ;;  %p861_p8 = scmp.lt.s32.totalorder %s1521_s22, %s859_s5 }
  0xf6   : > { %648 = vst [vmem:[%s1097_s16 + $0x420] sm:$0xff] %v497_v53  ;;  %649 = vst [vmem:[%s1097_s16 + $0x428] sm:$0xff] %v498_v45  ;;  %v485_v53 = vmul.f32 %v1428_v6, %v305_v35  ;;  %v488_v45 = vmul.f32 %v1428_v6, %v308_v30  ;;  %p862_p10 = scmp.lt.s32.totalorder %s860_s25, %s854_s29 }
  0xf7   : > { %650 = vst [vmem:[%s1097_s16 + $0x430] sm:$0xff] %v499_v56  ;;  %651 = vst [vmem:[%s1097_s16 + $0x438] sm:$0xff] %v500_v57  ;;  %v489_v56 = vmul.f32 %v1428_v6, %v309_v42 }
  0xf8   : > { %652 = vst [vmem:[%s1097_s16 + $0x440] sm:$0xff] %v501_v58  ;;  %653 = vst [vmem:[%s1097_s16 + $0x448] sm:$0xff] %v502_v63  ;;  %p863_p1 = por %p862_p10, %p861_p8 }
  0xf9   : > { %654 = vst [vmem:[%s1097_s16 + $0x450] sm:$0xff] %v503_v0  ;;  %655 = vst [vmem:[%s1097_s16 + $0x458] sm:$0xff] %v504_v1 }
  0xfa   : > { %656 = vst [vmem:[%s1097_s16 + $0x460] sm:$0xff] %v505_v2  ;;  %657 = vst [vmem:[%s1097_s16 + $0x468] sm:$0xff] %v506_v60  ;;  %p864_p3 = pnand %p863_p1, %p857_p7 }
  0xfb   : > { %658 = vst [vmem:[%s1097_s16 + $0x470] sm:$0xff] %v507_v7  ;;  %659 = vst [vmem:[%s1097_s16 + $0x478] sm:$0xff] %v508_v8 }
  0xfc   : > { %660 = vst [vmem:[%s1097_s16 + $0x480] sm:$0xff] %v509_v9  ;;  %661 = vst [vmem:[%s1097_s16 + $0x488] sm:$0xff] %v510_v13 }
  0xfd   : > { %662 = vst [vmem:[%s1097_s16 + $0x490] sm:$0xff] %v511_v14  ;;  %663 = vst [vmem:[%s1097_s16 + $0x498] sm:$0xff] %v512_v15 }
  0xfe   : > { %664 = vst [vmem:[%s1097_s16 + $0x4a0] sm:$0xff] %v513_v16  ;;  %665 = vst.msk [vmem:[%s1097_s16 + $0x4a8] sm:$0xff] %vm539_vm0, %v514_v20 }
  0xff   : > { %616 = vst [vmem:[%s1097_s16 + $0x320] sm:$0xff] %v465_v25  ;;  %617 = vst [vmem:[%s1097_s16 + $0x328] sm:$0xff] %v466_v26 }
 0x100   : > { %618 = vst [vmem:[%s1097_s16 + $0x330] sm:$0xff] %v467_v27  ;;  %619 = vst [vmem:[%s1097_s16 + $0x338] sm:$0xff] %v468_v31 }
 0x101   : > { %620 = vst [vmem:[%s1097_s16 + $0x340] sm:$0xff] %v469_v32  ;;  %621 = vst [vmem:[%s1097_s16 + $0x348] sm:$0xff] %v470_v33 }
 0x102   : > { %622 = vst [vmem:[%s1097_s16 + $0x350] sm:$0xff] %v471_v34  ;;  %623 = vst [vmem:[%s1097_s16 + $0x358] sm:$0xff] %v472_v38 }
 0x103   : > { %624 = vst [vmem:[%s1097_s16 + $0x360] sm:$0xff] %v473_v39  ;;  %625 = vst [vmem:[%s1097_s16 + $0x368] sm:$0xff] %v474_v40 }
 0x104   : > { %626 = vst [vmem:[%s1097_s16 + $0x370] sm:$0xff] %v475_v41  ;;  %627 = vst [vmem:[%s1097_s16 + $0x378] sm:$0xff] %v476_v43 }
 0x105   : > { %628 = vst [vmem:[%s1097_s16 + $0x380] sm:$0xff] %v477_v44  ;;  %629 = vst [vmem:[%s1097_s16 + $0x388] sm:$0xff] %v478_v46 }
 0x106   : > { %630 = vst [vmem:[%s1097_s16 + $0x390] sm:$0xff] %v479_v47  ;;  %631 = vst [vmem:[%s1097_s16 + $0x398] sm:$0xff] %v480_v48 }
 0x107   : > { %632 = vst [vmem:[%s1097_s16 + $0x3a0] sm:$0xff] %v481_v49  ;;  %633 = vst [vmem:[%s1097_s16 + $0x3a8] sm:$0xff] %v482_v50 }
 0x108   : > { %634 = vst [vmem:[%s1097_s16 + $0x3b0] sm:$0xff] %v483_v51  ;;  %635 = vst [vmem:[%s1097_s16 + $0x3b8] sm:$0xff] %v484_v52 }
 0x109   : > { %636 = vst [vmem:[%s1097_s16 + $0x3c0] sm:$0xff] %v485_v53  ;;  %637 = vst [vmem:[%s1097_s16 + $0x3c8] sm:$0xff] %v486_v54 }
 0x10a   : > { %638 = vst [vmem:[%s1097_s16 + $0x3d0] sm:$0xff] %v487_v55  ;;  %639 = vst [vmem:[%s1097_s16 + $0x3d8] sm:$0xff] %v488_v45 }
 0x10b   : > { %640 = vst.msk [vmem:[%s1097_s16 + $0x3e0] sm:$0xff] %vm539_vm0, %v489_v56 }
 0x10c   : > { %867 = shalt.err (!%p864_p3)
}
 0x10d   : > { %s868_s28 = scalar_lea.hbm %s1519_s26, 19200  ;;  %s872_s6 = scalar_lea.hbm %s1579_s2, 38400 }
 0x10e   : > { %p869_p9 = scmp.ne.s32.totalorder %s1519_s26, %s868_s28  ;;  %p873_p6 = scmp.lt.s32.totalorder %s1519_s26, %s1579_s2 }
 0x10f   : > { %p874_p11 = scmp.lt.s32.totalorder %s872_s6, %s868_s28 }
 0x110   : > { %p870_p0 = pnand %p869_p9, %p1588_p4 }
 0x111   : > { %p875_p12 = por %p874_p11, %p873_p6 }
 0x112   : > { %p871_p2 = pneg %p870_p0 }
 0x114   : > { %p876_p13 = pnand %p875_p12, %p871_p2 }
 0x116   : > { %879 = shalt.err (!%p876_p13)
}
 0x117   : > { %s925_s8 = smov 3200   ;;  %s926_s14 = smov 200  }
 0x118   : > { %773 = dma.vmem_to_hbm [thread:$0]  (%p1588_p4), %s1521_s22, 19200, %s1519_s26, %s667_s13, %s925_s8, %s925_s8, %s926_s14  }
 0x119 PF: > { %s696_s16 = sand.u32 1, %s906_s9   ;;  %p1589_p5 = scmp.ne.s32.totalorder %s1584_s21, 0 }
 0x11a   : > { %p1590_p7 = scmp.ge.s32.totalorder %s918_s12, 2  ;;  %s697_s17 = scalar_lea.sflag [#allocation4], %s696_s16 }
 0x11c   : > { %p780_p8 = pnand %p1590_p7, %p1589_p5 }
 0x11e   : > { %p781_p10 = pneg %p780_p8 }
 0x120   : > { %901 = dma.done.wait (%p781_p10), %s697_s17, 19200  }
 0x121   : > { %903 = vsyncadd (%p781_p10), %s697_s17, 4294948096  ;;  %p15_p1 = scmp.ge.s32.totalorder %s967_s15, 4   ;;  %s1591_s9 = smov %s910_s10 }
 0x122   : > { %s1592_s10 = smov %s914_s11  ;;  %s1593_s11 = smov %s979_s18 }
 0x123   : > { %s1594_s12 = smov %s967_s15  ;;  %17 = sbr.rel (!%p15_p1) target bundleno = 5 (0x5), region = 74 }
 0x128   :  { %702 = vsyncpa [#allocation3], 1 }
 0x129   :  { %704 = vsyncpa [#allocation3 + $0x1], 1 }
 0x12a   :  { %705 = vsyncpa [#allocation4], 1 }
 0x12b   :  { %707 = vsyncpa [#allocation4 + $0x1], 1 }

</bundles_post_ra>
